<compile_context>
chip_gen: v7x
topology: tpu7x:2x2x1
jax: 0.10.0
libtpu: 0.0.40
codegen_flags: <defaults>
</compile_context>

<pallas_src>
import functools
import math

import jax
import jax.numpy as jnp
from jax.experimental import pallas as pl
from jax.experimental.pallas import tpu as pltpu


# dot_general dimension numbers for A @ B.T (contract last dim of both) — the
# "NT" pattern used by splash attention; lets the kernel consume obs in its
# natural (batch, feature) layout with no wrapper-side transpose HBM pass.
_NT_DIMS = (((1,), (1,)), ((), ()))


def _round_up(x, m):
    return ((x + m - 1) // m) * m


def _nan_to_num(x):
    """torch.nan_to_num default semantics: nan->0, +inf->max, -inf->min."""
    finfo = jnp.finfo(x.dtype)
    x = jnp.where(jnp.isnan(x), jnp.zeros_like(x), x)
    return jnp.clip(x, finfo.min, finfo.max)


def actor_forward_kernel(obs_ref, act_t_ref, w1t_ref, w2t_ref, w3t_ref,
                         const_ref, out_ref, *,
                         h1, h2, act_dim, off_b2, off_b3, off_inv, off_c,
                         out_rows):
    """Fused MLP policy forward + Gaussian log-prob.

    obs_ref   : (TB, obs_dim)  natural layout (TB on sublanes here only)
    act_t_ref : (act_dim, TB)  feature-major (batch on lanes)
    wKt_ref   : transposed weights (out_dim, in_dim)
    const_ref : (n, 1) packed [b1 | b2 | b3 | inv_std | sum_c], 8-row aligned
    out_ref   : (out_rows, TB): rows 0..act_dim-1 = mu^T, row act_dim = logp
    """
    obs = obs_ref[...]                                           # (TB, obs_dim)

    # Layer 1: w1t @ obs.T via NT dot_general -> (h1, TB); from here on the
    # whole computation is feature-major, so the batch sits on the lane axis.
    h = jax.lax.dot_general(w1t_ref[...], obs, _NT_DIMS,
                            preferred_element_type=jnp.float32)
    h = jnp.tanh(h + const_ref[0:h1, :])                         # (h1, TB)
    h = jnp.dot(w2t_ref[...], h, preferred_element_type=jnp.float32)
    h = jnp.tanh(h + const_ref[off_b2:off_b2 + h2, :])           # (h2, TB)
    mu_t = jnp.dot(w3t_ref[...], h, preferred_element_type=jnp.float32)
    mu_t = _nan_to_num(mu_t + const_ref[off_b3:off_b3 + act_dim, :])  # (act_dim, TB)

    # Normal(mu, std).log_prob(nan_to_num(act)).sum(-1)
    act_t = _nan_to_num(act_t_ref[...])                          # (act_dim, TB)
    z = (act_t - mu_t) * const_ref[off_inv:off_inv + act_dim, :]
    logp = (jnp.sum(-0.5 * (z * z), axis=0, keepdims=True)
            + const_ref[off_c:off_c + 1, :])                     # (1, TB)

    # Single packed lane-dense output slab (one writeback DMA per step).
    out_ref[0:act_dim, :] = mu_t.astype(out_ref.dtype)
    out_ref[act_dim:out_rows, :] = jnp.broadcast_to(
        logp, (out_rows - act_dim, logp.shape[1])).astype(out_ref.dtype)


@functools.partial(jax.jit, static_argnames=("max_batch_tile",))
def actor_forward(obs, act, params, max_batch_tile=4096):
    """Returns (mu, log_std, logp_a) == (Normal(mu, exp(log_std)), logp_a)."""
    w1, b1, w2, b2, w3, b3, log_std = params
    B, obs_dim = obs.shape
    h1 = w1.shape[1]
    h2 = w2.shape[1]
    act_dim = w3.shape[1]

    # --- batch tiling --------------------------------------------------------
    # * B <= 256 : one lane-padded tile (padding a tiny batch is negligible and
    #              keeps every block within well-trodden exact-block territory).
    # * B  > 256 : >=2 lane-aligned tiles (v7x dual-TC), capped at
    #              max_batch_tile; NO padding pass — the last block is ragged
    #              and Pallas handles the partial DMA (garbage lanes are per-
    #              lane independent and sliced off below).
    if B <= 256:
        batch_tile = _round_up(B, 128)
        b_cols = batch_tile
    else:
        half = (B + 1) // 2
        batch_tile = min(max_batch_tile, _round_up(half, 128))
        b_cols = B
    grid = (pl.cdiv(b_cols, batch_tile),)

    obs_in = obs                       # natural layout, no transpose/pad pass
    act_t = act.T                      # tiny (B*act_dim) vs obs: negligible
    if b_cols != B:                    # only in the small-batch branch
        obs_in = jnp.pad(obs_in, ((0, b_cols - B), (0, 0)))
        act_t = jnp.pad(act_t, ((0, 0), (0, b_cols - B)))

    # Pre-transposed weights.
    w1t = w1.T                         # (h1, obs_dim)
    w2t = w2.T                         # (h2, h1)
    w3t = w3.T                         # (act_dim, h2)

    # Packed column constants: [b1 | b2 | b3 | inv_std | sum_c], each section
    # starting at an 8-row-aligned offset so all in-kernel slices are cheap.
    off_b2 = _round_up(h1, 8)
    off_b3 = off_b2 + _round_up(h2, 8)
    off_inv = off_b3 + _round_up(act_dim, 8)
    off_c = off_inv + _round_up(act_dim, 8)
    n_const = off_c + 1

    inv_std = jnp.exp(-log_std)
    sum_c = -(jnp.sum(log_std) + act_dim * 0.5 * math.log(2.0 * math.pi))
    consts = jnp.zeros((n_const,), jnp.float32)
    consts = consts.at[0:h1].set(b1)
    consts = consts.at[off_b2:off_b2 + h2].set(b2)
    consts = consts.at[off_b3:off_b3 + act_dim].set(b3)
    consts = consts.at[off_inv:off_inv + act_dim].set(inv_std)
    consts = consts.at[off_c].set(sum_c)
    consts = consts.reshape(n_const, 1)

    out_rows = _round_up(act_dim + 1, 8)
    rep = lambda i: (0, 0)             # weights/constants: same block each step

    kernel = functools.partial(
        actor_forward_kernel, h1=h1, h2=h2, act_dim=act_dim,
        off_b2=off_b2, off_b3=off_b3, off_inv=off_inv, off_c=off_c,
        out_rows=out_rows)

    out = pl.pallas_call(
        kernel,
        out_shape=jax.ShapeDtypeStruct((out_rows, b_cols), jnp.float32),
        grid_spec=pltpu.PrefetchScalarGridSpec(
            num_scalar_prefetch=0,
            grid=grid,
            in_specs=[
                pl.BlockSpec((batch_tile, obs_dim), lambda i: (i, 0)),
                pl.BlockSpec((act_dim, batch_tile), lambda i: (0, i)),
                pl.BlockSpec((h1, obs_dim), rep),
                pl.BlockSpec((h2, h1), rep),
                pl.BlockSpec((act_dim, h2), rep),
                pl.BlockSpec((n_const, 1), rep),
            ],
            out_specs=pl.BlockSpec((out_rows, batch_tile), lambda i: (0, i)),
        ),
        compiler_params=pltpu.CompilerParams(
            dimension_semantics=("parallel",)),
    )(obs_in, act_t, w1t, w2t, w3t, consts)

    mu = out[:act_dim, :B].T           # (B, act_dim)
    logp = out[act_dim, :B]            # (B,)
    return mu, log_std, logp


def init_actor_params(key, obs_dim, act_dim, hidden=(64, 64)):
    """Deterministic synthetic init matching the module's parameter shapes."""
    k1, k2, k3 = jax.random.split(key, 3)
    h1, h2 = hidden
    scale = 0.1
    w1 = scale * jax.random.normal(k1, (obs_dim, h1), jnp.float32)
    b1 = jnp.zeros((h1,), jnp.float32)
    w2 = scale * jax.random.normal(k2, (h1, h2), jnp.float32)
    b2 = jnp.zeros((h2,), jnp.float32)
    w3 = scale * jax.random.normal(k3, (h2, act_dim), jnp.float32)
    b3 = jnp.zeros((act_dim,), jnp.float32)
    # log_std = log(0.5) * ones(act_dim)  (non-trainable parameter in torch)
    log_std = jnp.full((act_dim,), jnp.log(0.5), jnp.float32)
    return (w1, b1, w2, b2, w3, b3, log_std)


def actor_forward_reference(obs, act, params):
    """Pure-JAX reference of the PyTorch forward pass."""
    w1, b1, w2, b2, w3, b3, log_std = params
    h = jnp.tanh(obs @ w1 + b1)
    h = jnp.tanh(h @ w2 + b2)
    mu = _nan_to_num(h @ w3 + b3)
    act = _nan_to_num(act)
    std = jnp.exp(log_std)
    logp = -0.5 * ((act - mu) / std) ** 2 - log_std - 0.5 * math.log(2.0 * math.pi)
    return mu, logp.sum(-1)


if __name__ == "__main__":
    obs_dim, act_dim = 32, 4

    key = jax.random.PRNGKey(0)
    k_obs, k_act, k_par, k_obs2, k_act2 = jax.random.split(key, 5)
    params = init_actor_params(k_par, obs_dim, act_dim, hidden=(64, 64))

    # --- small batch: single 128-lane tile, exercises the nan_to_num path ---
    batch = 8
    obs = jax.random.normal(k_obs, (batch, obs_dim), jnp.float32)
    act = jax.random.normal(k_act, (batch, act_dim), jnp.float32)
    act = act.at[0, 0].set(jnp.nan).at[1, 1].set(jnp.inf)

    mu, log_std, logp_a = actor_forward(obs, act, params)
    jax.block_until_ready((mu, logp_a))

    mu_ref, logp_ref = actor_forward_reference(obs, act, params)
    assert mu.shape == (batch, act_dim) and logp_a.shape == (batch,)
    assert jnp.allclose(mu, mu_ref, atol=1e-5, rtol=1e-5)
    assert jnp.allclose(logp_a, logp_ref, atol=1e-5, rtol=1e-5)

    # --- mid-size batch: 2 grid steps (dual-TC on v7x) + ragged, un-padded
    #     last block (no wrapper-side pad pass over obs) --------------------
    batch2 = 300
    obs2 = jax.random.normal(k_obs2, (batch2, obs_dim), jnp.float32)
    act2 = jax.random.normal(k_act2, (batch2, act_dim), jnp.float32)
    mu2, _, logp2 = actor_forward(obs2, act2, params)
    jax.block_until_ready((mu2, logp2))

    mu2_ref, logp2_ref = actor_forward_reference(obs2, act2, params)
    assert mu2.shape == (batch2, act_dim) and logp2.shape == (batch2,)
    assert jnp.allclose(mu2, mu2_ref, atol=1e-5, rtol=1e-5)
    assert jnp.allclose(logp2, logp2_ref, atol=1e-5, rtol=1e-5)

    # TODO(synk): pi.sample() (the stochastic `sample` path) needs in-kernel RNG
    # (pltpu.prng_*) plumbing and is not part of forward(); omitted.
    print("KERNEL_OK")
</pallas_src>

<mosaic_0001>
module attributes {stable_mosaic.version = 11 : i64} {
  func.func @actor_forward_kernel(%arg0: i32, %arg1: memref<128x32xf32, #tpu.memory_space<vmem>>, %arg2: memref<4x128xf32, #tpu.memory_space<vmem>>, %arg3: memref<64x32xf32, #tpu.memory_space<vmem>>, %arg4: memref<64x64xf32, #tpu.memory_space<vmem>>, %arg5: memref<4x64xf32, #tpu.memory_space<vmem>>, %arg6: memref<145x1xf32, #tpu.memory_space<vmem>>, %arg7: memref<8x128xf32, #tpu.memory_space<vmem>>) attributes {dimension_semantics = [#tpu.dimension_semantics<parallel>], iteration_bounds = array<i64: 1>, scalar_prefetch = 0 : i64, scratch_operands = 0 : i64, tpu.core_type = #tpu.core_type<tc>, window_params = [{transform_indices = @transform_0, window_bounds = array<i64: 128, 32>}, {transform_indices = @transform_1, window_bounds = array<i64: 4, 128>}, {pipeline_mode = #tpu.pipeline_mode<synchronous>, transform_indices = @transform_2, window_bounds = array<i64: 64, 32>}, {pipeline_mode = #tpu.pipeline_mode<synchronous>, transform_indices = @transform_3, window_bounds = array<i64: 64, 64>}, {pipeline_mode = #tpu.pipeline_mode<synchronous>, transform_indices = @transform_4, window_bounds = array<i64: 4, 64>}, {pipeline_mode = #tpu.pipeline_mode<synchronous>, transform_indices = @transform_5, window_bounds = array<i64: 145, 1>}, {transform_indices = @transform_6, window_bounds = array<i64: 8, 128>}]} {
    %c0 = arith.constant 0 : index
    %c0_0 = arith.constant 0 : index
    %0 = vector.load %arg1[%c0, %c0_0] : memref<128x32xf32, #tpu.memory_space<vmem>>, vector<128x32xf32>
    %c0_1 = arith.constant 0 : index
    %c0_2 = arith.constant 0 : index
    %1 = vector.load %arg3[%c0_1, %c0_2] : memref<64x32xf32, #tpu.memory_space<vmem>>, vector<64x32xf32>
    %cst = arith.constant dense<0.000000e+00> : vector<64x128xf32>
    %2 = tpu.matmul %1, %0, %cst {dimension_numbers = #tpu.dot_dimension_numbers<[1], [1], [0], [0], [0, 0, 1, 0], [], []>} : vector<64x32xf32>, vector<128x32xf32>, vector<64x128xf32> -> vector<64x128xf32>
    %c0_3 = arith.constant 0 : index
    %c0_4 = arith.constant 0 : index
    %3 = vector.load %arg6[%c0_3, %c0_4] : memref<145x1xf32, #tpu.memory_space<vmem>>, vector<64x1xf32>
    %4 = vector.broadcast %3 : vector<64x1xf32> to vector<64x128xf32>
    %5 = arith.addf %2, %4 : vector<64x128xf32>
    %6 = math.tanh %5 : vector<64x128xf32>
    %c0_5 = arith.constant 0 : index
    %c0_6 = arith.constant 0 : index
    %7 = vector.load %arg4[%c0_5, %c0_6] : memref<64x64xf32, #tpu.memory_space<vmem>>, vector<64x64xf32>
    %cst_7 = arith.constant dense<0.000000e+00> : vector<64x128xf32>
    %8 = tpu.matmul %7, %6, %cst_7 {dimension_numbers = #tpu.dot_dimension_numbers<[1], [0], [0], [1], [0, 0, 1, 1], [], []>} : vector<64x64xf32>, vector<64x128xf32>, vector<64x128xf32> -> vector<64x128xf32>
    %c64 = arith.constant 64 : index
    %c0_8 = arith.constant 0 : index
    %9 = vector.load %arg6[%c64, %c0_8] : memref<145x1xf32, #tpu.memory_space<vmem>>, vector<64x1xf32>
    %10 = vector.broadcast %9 : vector<64x1xf32> to vector<64x128xf32>
    %11 = arith.addf %8, %10 : vector<64x128xf32>
    %12 = math.tanh %11 : vector<64x128xf32>
    %c0_9 = arith.constant 0 : index
    %c0_10 = arith.constant 0 : index
    %13 = vector.load %arg5[%c0_9, %c0_10] : memref<4x64xf32, #tpu.memory_space<vmem>>, vector<4x64xf32>
    %cst_11 = arith.constant dense<0.000000e+00> : vector<4x128xf32>
    %14 = tpu.matmul %13, %12, %cst_11 {dimension_numbers = #tpu.dot_dimension_numbers<[1], [0], [0], [1], [0, 0, 1, 1], [], []>} : vector<4x64xf32>, vector<64x128xf32>, vector<4x128xf32> -> vector<4x128xf32>
    %c128 = arith.constant 128 : index
    %c0_12 = arith.constant 0 : index
    %15 = vector.load %arg6[%c128, %c0_12] : memref<145x1xf32, #tpu.memory_space<vmem>>, vector<4x1xf32>
    %16 = vector.broadcast %15 : vector<4x1xf32> to vector<4x128xf32>
    %17 = arith.addf %14, %16 : vector<4x128xf32>
    %18 = arith.cmpf one, %17, %17 : vector<4x128xf32>
    %cst_13 = arith.constant 0.000000e+00 : f32
    %19 = vector.broadcast %cst_13 : f32 to vector<4x128xf32>
    %20 = arith.select %18, %19, %17 : vector<4x128xi1>, vector<4x128xf32>
    %cst_14 = arith.constant -3.40282347E+38 : f32
    %cst_15 = arith.constant 3.40282347E+38 : f32
    %21 = vector.broadcast %cst_14 : f32 to vector<4x128xf32>
    %22 = arith.maximumf %21, %20 : vector<4x128xf32>
    %23 = vector.broadcast %cst_15 : f32 to vector<4x128xf32>
    %24 = arith.minimumf %23, %22 : vector<4x128xf32>
    %c0_16 = arith.constant 0 : index
    %c0_17 = arith.constant 0 : index
    %25 = vector.load %arg2[%c0_16, %c0_17] : memref<4x128xf32, #tpu.memory_space<vmem>>, vector<4x128xf32>
    %26 = arith.cmpf one, %25, %25 : vector<4x128xf32>
    %cst_18 = arith.constant 0.000000e+00 : f32
    %27 = vector.broadcast %cst_18 : f32 to vector<4x128xf32>
    %28 = arith.select %26, %27, %25 : vector<4x128xi1>, vector<4x128xf32>
    %cst_19 = arith.constant -3.40282347E+38 : f32
    %cst_20 = arith.constant 3.40282347E+38 : f32
    %29 = vector.broadcast %cst_19 : f32 to vector<4x128xf32>
    %30 = arith.maximumf %29, %28 : vector<4x128xf32>
    %31 = vector.broadcast %cst_20 : f32 to vector<4x128xf32>
    %32 = arith.minimumf %31, %30 : vector<4x128xf32>
    %33 = arith.subf %32, %24 : vector<4x128xf32>
    %c136 = arith.constant 136 : index
    %c0_21 = arith.constant 0 : index
    %34 = vector.load %arg6[%c136, %c0_21] : memref<145x1xf32, #tpu.memory_space<vmem>>, vector<4x1xf32>
    %35 = vector.broadcast %34 : vector<4x1xf32> to vector<4x128xf32>
    %36 = arith.mulf %33, %35 : vector<4x128xf32>
    %37 = arith.mulf %36, %36 : vector<4x128xf32>
    %cst_22 = arith.constant -5.000000e-01 : f32
    %38 = vector.broadcast %cst_22 : f32 to vector<4x128xf32>
    %39 = arith.mulf %38, %37 : vector<4x128xf32>
    %cst_23 = arith.constant dense<0.000000e+00> : vector<128xf32>
    %40 = vector.multi_reduction <add>, %39, %cst_23 [0] : vector<4x128xf32> to vector<128xf32>
    %41 = vector.shape_cast %40 : vector<128xf32> to vector<1x128xf32>
    %c144 = arith.constant 144 : index
    %c0_24 = arith.constant 0 : index
    %42 = vector.load %arg6[%c144, %c0_24] : memref<145x1xf32, #tpu.memory_space<vmem>>, vector<1x1xf32>
    %43 = vector.broadcast %42 : vector<1x1xf32> to vector<1x128xf32>
    %44 = arith.addf %41, %43 : vector<1x128xf32>
    %c0_25 = arith.constant 0 : index
    %c0_26 = arith.constant 0 : index
    %45 = vector.load %arg7[%c0_25, %c0_26] : memref<8x128xf32, #tpu.memory_space<vmem>>, vector<4x128xf32>
    tpu.vector_store %arg7[%c0_25, %c0_26], %24 {strides = array<i32>} : memref<8x128xf32, #tpu.memory_space<vmem>>, vector<4x128xf32>,
    %46 = vector.shape_cast %44 : vector<1x128xf32> to vector<1x128xf32>
    %47 = vector.broadcast %46 : vector<1x128xf32> to vector<4x128xf32>
    %c4 = arith.constant 4 : index
    %c0_27 = arith.constant 0 : index
    %48 = vector.load %arg7[%c4, %c0_27] : memref<8x128xf32, #tpu.memory_space<vmem>>, vector<4x128xf32>
    tpu.vector_store %arg7[%c4, %c0_27], %47 {strides = array<i32>} : memref<8x128xf32, #tpu.memory_space<vmem>>, vector<4x128xf32>,
    return
  }
  func.func @transform_0(%arg0: i32) -> (i32, i32) {
    %c0_i32 = arith.constant 0 : i32
    %c0_i32_0 = arith.constant 0 : i32
    return %arg0, %c0_i32 : i32, i32
  }
  func.func @transform_1(%arg0: i32) -> (i32, i32) {
    %c0_i32 = arith.constant 0 : i32
    %c0_i32_0 = arith.constant 0 : i32
    return %c0_i32, %arg0 : i32, i32
  }
  func.func @transform_2(%arg0: i32) -> (i32, i32) {
    %c0_i32 = arith.constant 0 : i32
    %c0_i32_0 = arith.constant 0 : i32
    %c0_i32_1 = arith.constant 0 : i32
    return %c0_i32, %c0_i32_0 : i32, i32
  }
  func.func @transform_3(%arg0: i32) -> (i32, i32) {
    %c0_i32 = arith.constant 0 : i32
    %c0_i32_0 = arith.constant 0 : i32
    %c0_i32_1 = arith.constant 0 : i32
    return %c0_i32, %c0_i32_0 : i32, i32
  }
  func.func @transform_4(%arg0: i32) -> (i32, i32) {
    %c0_i32 = arith.constant 0 : i32
    %c0_i32_0 = arith.constant 0 : i32
    %c0_i32_1 = arith.constant 0 : i32
    return %c0_i32, %c0_i32_0 : i32, i32
  }
  func.func @transform_5(%arg0: i32) -> (i32, i32) {
    %c0_i32 = arith.constant 0 : i32
    %c0_i32_0 = arith.constant 0 : i32
    %c0_i32_1 = arith.constant 0 : i32
    return %c0_i32, %c0_i32_0 : i32, i32
  }
  func.func @transform_6(%arg0: i32) -> (i32, i32) {
    %c0_i32 = arith.constant 0 : i32
    %c0_i32_0 = arith.constant 0 : i32
    return %c0_i32, %arg0 : i32, i32
  }
}

</mosaic_0001>

<bundles_post_ra>
// kernel: actor_forward.1
= control target key start
LH: loop header
LB: loop body
LE: loop exit
PB: predicated region body
PF: predicated region fallthrough
CT: control target
= control target key end

     0   :  { %vm95_vm0 = vcmask 261120   ;;  %v888_v3 = vmov 0   ;;  %vm337_vm2 = vcmask 523264   ;;  %vm890_vm3 = vmmov 0   ;;  %s1147_s0 = inlined_call_operand.vmem [shape: f32[128,32], index: 0, kind: input, shape index: {}]   ;;  %s1148_s2 = inlined_call_operand.vmem [shape: f32[64,32], index: 2, kind: input, shape index: {}]   ;;  %s1149_s5 = inlined_call_operand.vmem [shape: f32[145,1], index: 5, kind: input, shape index: {}]   ;;  %s1150_s3 = inlined_call_operand.vmem [shape: f32[64,64], index: 3, kind: input, shape index: {}]   ;;  %s1151_s4 = inlined_call_operand.vmem [shape: f32[4,64], index: 4, kind: input, shape index: {}]   ;;  %s1152_s1 = inlined_call_operand.vmem [shape: f32[4,128], index: 1, kind: input, shape index: {}]   ;;  %s1153_s6 = inlined_call_operand.vmem [shape: f32[8,128], index: 6, kind: output, shape index: {}]  }
   0x1   :  { %v23_v0 = vld [vmem:[%s1147_s0] sm:$0xff]  ;;  %v24_v1 = vld [vmem:[%s1147_s0 + $0x8] sm:$0xff]  ;;  %vm935_vm1 = vmpackc.low %vm95_vm0, %vm95_vm0  ;;  %854 = vset.pattern.permute.xlu0 %v888_v3  ;;  %855 = vset.pattern.permute.xlu1 %v888_v3  ;;  %vm574_vm6 = vcmask 1043456  }
   0x2   :  { %v774_v4 = vpack.c.bf16 %v24_v1, %v23_v0  ;;  %v25_v5 = vld [vmem:[%s1147_s0 + $0x10] sm:$0xff]  ;;  %v26_v6 = vld [vmem:[%s1147_s0 + $0x18] sm:$0xff]  ;;  %v39_v8 = vld [vmem:[%s1148_s2] sm:$0xff] }
   0x3   :  { %v780_v7 = vpack.c.bf16 %v26_v6, %v25_v5  ;;  %v27_v9 = vld [vmem:[%s1147_s0 + $0x20] sm:$0xff]  ;;  %v28_v10 = vld [vmem:[%s1147_s0 + $0x28] sm:$0xff]  ;;  %715 = vmatprep.mubr.msk.f32.mxu0 %vm95_vm0, %v39_v8  ;;  %v49_v13 = vld [vmem:[%s1149_s5 + $0x10] sm:$0xff] }
   0x4   :  { %776 = vmatprep.subr.msk.bf16.mxu0 %vm935_vm1, %v774_v4  ;;  %v47_v11 = vld [vmem:[%s1149_s5] sm:$0xff]  ;;  %v786_v12 = vpack.c.bf16 %v28_v10, %v27_v9  ;;  %v48_v14 = vld [vmem:[%s1149_s5 + $0x8] sm:$0xff]  ;;  %67 = vperm.xlu1 %855, %v49_v13   ;;  %v50_v15 = vld [vmem:[%s1149_s5 + $0x18] sm:$0xff] }
   0x5   :  { %779 = vmatpush3.bf16.xpose.msk.msra.mxu0 %vm935_vm1, %v774_v4  ;;  %57 = vperm.xlu0 %854, %v47_v11   ;;  %v29_v16 = vld [vmem:[%s1147_s0 + $0x30] sm:$0xff]  ;;  %v30_v17 = vld [vmem:[%s1147_s0 + $0x38] sm:$0xff]  ;;  %v51_v18 = vld [vmem:[%s1149_s5 + $0x20] sm:$0xff] }
   0x6   :  { %782 = vmatprep.subr.msk.bf16.mxu0 %vm935_vm1, %v780_v7  ;;  %v52_v19 = vld [vmem:[%s1149_s5 + $0x28] sm:$0xff]  ;;  %v792_v20 = vpack.c.bf16 %v30_v17, %v29_v16  ;;  %v53_v21 = vld [vmem:[%s1149_s5 + $0x30] sm:$0xff]  ;;  %v54_v22 = vld [vmem:[%s1149_s5 + $0x38] sm:$0xff] }
   0x7   :  { %v31_v23 = vld [vmem:[%s1147_s0 + $0x40] sm:$0xff]  ;;  %v32_v24 = vld [vmem:[%s1147_s0 + $0x48] sm:$0xff]  ;;  %v291_v28 = vld [vmem:[%s1149_s5 + $0x50] sm:$0xff] }
   0x8   :  { %72 = vperm.xlu1 %855, %v50_v15   ;;  %v289_v25 = vld [vmem:[%s1149_s5 + $0x40] sm:$0xff]  ;;  %v290_v26 = vld [vmem:[%s1149_s5 + $0x48] sm:$0xff]  ;;  %v798_v27 = vpack.c.bf16 %v32_v24, %v31_v23  ;;  %v292_v29 = vld [vmem:[%s1149_s5 + $0x58] sm:$0xff] }
   0x9   :  { %62 = vperm.xlu0 %854, %v48_v14   ;;  %v33_v30 = vld [vmem:[%s1147_s0 + $0x50] sm:$0xff]  ;;  %v34_v31 = vld [vmem:[%s1147_s0 + $0x58] sm:$0xff]  ;;  %v293_v32 = vld [vmem:[%s1149_s5 + $0x60] sm:$0xff] }
   0xa   :  { %v294_v33 = vld [vmem:[%s1149_s5 + $0x68] sm:$0xff]  ;;  %v804_v34 = vpack.c.bf16 %v34_v31, %v33_v30  ;;  %v295_v35 = vld [vmem:[%s1149_s5 + $0x70] sm:$0xff]  ;;  %v296_v36 = vld [vmem:[%s1149_s5 + $0x78] sm:$0xff] }
   0xb   :  { %v35_v37 = vld [vmem:[%s1147_s0 + $0x60] sm:$0xff]  ;;  %v36_v38 = vld [vmem:[%s1147_s0 + $0x68] sm:$0xff]  ;;  %v582_v42 = vld [vmem:[%s1149_s5 + $0x90] sm:$0x1] }
   0xc   :  { %82 = vperm.xlu1 %855, %v52_v19   ;;  %v476_v39 = vld [vmem:[%s1149_s5 + $0x80] sm:$0xf]  ;;  %v565_v40 = vld [vmem:[%s1149_s5 + $0x88] sm:$0xf]  ;;  %v810_v41 = vpack.c.bf16 %v36_v38, %v35_v37  ;;  %v37_v43 = vld [vmem:[%s1147_s0 + $0x70] sm:$0xff] }
   0xd   :  { %785 = vmatpush3.bf16.xpose.msk.msra.mxu0 %vm935_vm1, %v780_v7  ;;  %77 = vperm.xlu0 %854, %v51_v18   ;;  %v38_v44 = vld [vmem:[%s1147_s0 + $0x78] sm:$0xff]  ;;  %v40_v46 = vld [vmem:[%s1148_s2 + $0x8] sm:$0xff]  ;;  %v41_v47 = vld [vmem:[%s1148_s2 + $0x10] sm:$0xff] }
   0xe   :  { %788 = vmatprep.subr.msk.bf16.mxu0 %vm935_vm1, %v786_v12  ;;  %v816_v45 = vpack.c.bf16 %v38_v44, %v37_v43  ;;  %v42_v48 = vld [vmem:[%s1148_s2 + $0x18] sm:$0xff]  ;;  %v43_v49 = vld [vmem:[%s1148_s2 + $0x20] sm:$0xff]  ;;  %v44_v50 = vld [vmem:[%s1148_s2 + $0x28] sm:$0xff] }
   0xf   :  { %v45_v51 = vld [vmem:[%s1148_s2 + $0x30] sm:$0xff]  ;;  %v46_v52 = vld [vmem:[%s1148_s2 + $0x38] sm:$0xff]  ;;  %v281_v53 = vld [vmem:[%s1150_s3] sm:$0xff] }
  0x10   :  { %92 = vperm.xlu1 %855, %v54_v22   ;;  %743 = vmatprep.mubr.msk.f32.mxu1 %vm337_vm2, %v281_v53  ;;  %v286_v30 = vld [vmem:[%s1150_s3 + $0x28] sm:$0xff]  ;;  %v287_v31 = vld [vmem:[%s1150_s3 + $0x30] sm:$0xff] }
  0x11   :  { %87 = vperm.xlu0 %854, %v53_v21  }
  0x14   :  { %304 = vperm.xlu1 %855, %v290_v26   ;;  %v282_v26 = vld [vmem:[%s1150_s3 + $0x8] sm:$0xff] }
  0x15   :  { %791 = vmatpush3.bf16.xpose.msk.msra.mxu0 %vm935_vm1, %v786_v12  ;;  %299 = vperm.xlu0 %854, %v289_v25  }
  0x16   :  { %794 = vmatprep.subr.msk.bf16.mxu0 %vm935_vm1, %v792_v20 }
  0x18   :  { %314 = vperm.xlu1 %855, %v292_v29   ;;  %v285_v29 = vld [vmem:[%s1150_s3 + $0x20] sm:$0xff] }
  0x19   :  { %309 = vperm.xlu0 %854, %v291_v28   ;;  %v284_v28 = vld [vmem:[%s1150_s3 + $0x18] sm:$0xff] }
  0x1c   :  { %324 = vperm.xlu1 %855, %v294_v33   ;;  %v889_v33 = vmov 0.0|0.0  }
  0x1d   :  { %797 = vmatpush3.bf16.xpose.msk.msra.mxu0 %vm935_vm1, %v792_v20  ;;  %319 = vperm.xlu0 %854, %v293_v32   ;;  %v288_v32 = vld [vmem:[%s1150_s3 + $0x38] sm:$0xff] }
  0x1e   :  { %800 = vmatprep.subr.msk.bf16.mxu0 %vm935_vm1, %v798_v27 }
  0x20   :  { %334 = vperm.xlu1 %855, %v296_v36  }
  0x21   :  { %329 = vperm.xlu0 %854, %v295_v35  }
  0x24   :  { %568 = vperm.xlu1 %855, %v565_v40  }
  0x25   :  { %803 = vmatpush3.bf16.xpose.msk.msra.mxu0 %vm935_vm1, %v798_v27  ;;  %479 = vperm.xlu0 %854, %v476_v39   ;;  %v283_v27 = vld [vmem:[%s1150_s3 + $0x10] sm:$0xff] }
  0x26   :  { %806 = vmatprep.subr.msk.bf16.mxu0 %vm935_vm1, %v804_v34 }
  0x29   :  { %585 = vperm.xlu0 %854, %v582_v42  }
  0x2d   :  { %809 = vmatpush3.bf16.xpose.msk.msra.mxu0 %vm935_vm1, %v804_v34  ;;  %v891_v34 = vmov 0.0  }
  0x2e   :  { %812 = vmatprep.subr.msk.bf16.mxu0 %vm935_vm1, %v810_v41 }
  0x35   :  { %815 = vmatpush3.bf16.xpose.msk.msra.mxu0 %vm935_vm1, %v810_v41 }
  0x36   :  { %818 = vmatprep.subr.msk.bf16.mxu0 %vm935_vm1, %v816_v45 }
  0x3d   :  { %821 = vmatpush3.bf16.xpose.msk.msra.mxu0 %vm935_vm1, %v816_v45 }
  0x44   :  { %716 = vmatmul.mubr.msk.f32.vlgmr.msra.gmra.mrb[0].mxu0 %vm95_vm0, %v40_v46 }
  0x45   :  { %718 = vmatprep.mubr.msk.f32.mxu0 %vm95_vm0, %v41_v47 }
  0x48   :  { %719 = vmatmul.mubr.msk.f32.gmra.mrb[2].mxu0 %vm95_vm0, %v42_v48 }
  0x49   :  { %721 = vmatprep.mubr.msk.f32.mxu0 %vm95_vm0, %v43_v49 }
  0x4c   :  { %722 = vmatmul.mubr.msk.f32.gmra.mrb[4].mxu0 %vm95_vm0, %v44_v50 }
  0x4d   :  { %724 = vmatprep.mubr.msk.f32.mxu0 %vm95_vm0, %v45_v51 }
  0x50   :  { %725 = vmatmul.mubr.msk.f32.gmra.mrb[6].mxu0 %vm95_vm0, %v46_v52 }
  0x83   :  { %v68_v55 = vpop.permute.xlu1 %67 }
  0x84   :  { %v58_v54 = vpop.permute.xlu0 %57 }
  0x87   :  { %v73_v57 = vpop.permute.xlu1 %72 }
  0x88   :  { %v63_v56 = vpop.permute.xlu0 %62 }
  0x8b   :  { %v83_v1 = vpop.permute.xlu1 %82 }
  0x8c   :  { %v78_v3 = vpop.permute.xlu0 %77 }
  0x8f   :  { %v93_v8 = vpop.permute.xlu1 %92 }
  0x90   :  { %v88_v11 = vpop.permute.xlu0 %87 }
  0x93   :  { %v305_v35 = vpop.permute.xlu1 %304 }
  0x94   :  { %v300_v36 = vpop.permute.xlu0 %299 }
  0x97   :  { %v315_v37 = vpop.permute.xlu1 %314 }
  0x98   :  { %v310_v39 = vpop.permute.xlu0 %309 }
  0x9b   :  { %v325_v46 = vpop.permute.xlu1 %324 }
  0x9c   :  { %v320_v48 = vpop.permute.xlu0 %319 }
  0x9f   :  { %v335_v53 = vpop.permute.xlu1 %334 }
 0x117   :  { %v717_v58 = vpop.f32.mrb[0].mxu0 }
 0x118   :  { %v240_v59 = vadd.f32 %v717_v58, %v63_v56  ;;  %v234_v60 = vpop.f32.mrb[1].mxu0  ;;  %v330_v56 = vpop.permute.xlu0 %329 }
 0x119   :  { %v235_v61 = vadd.f32 %v234_v60, %v58_v54 }
 0x11a   :  { %856 = vtanh.f32 %v240_v59 }
 0x11b   :  { %858 = vtanh.f32 %v235_v61  ;;  %v720_v62 = vpop.f32.mrb[2].mxu0 }
 0x11c   :  { %v250_v63 = vadd.f32 %v720_v62, %v73_v57  ;;  %v244_v0 = vpop.f32.mrb[3].mxu0 }
 0x11d   :  { %v245_v2 = vadd.f32 %v244_v0, %v68_v55 }
 0x11e   :  { %860 = vtanh.f32 %v250_v63 }
 0x11f   :  { %862 = vtanh.f32 %v245_v2  ;;  %v723_v4 = vpop.f32.mrb[4].mxu0 }
 0x120   :  { %v260_v5 = vadd.f32 %v723_v4, %v83_v1  ;;  %v254_v6 = vpop.f32.mrb[5].mxu0 }
 0x121   :  { %v255_v7 = vadd.f32 %v254_v6, %v78_v3 }
 0x122   :  { %864 = vtanh.f32 %v260_v5 }
 0x123   :  { %866 = vtanh.f32 %v255_v7  ;;  %v726_v9 = vpop.f32.mrb[6].mxu0  ;;  %v475_v7 = vld [vmem:[%s1151_s4] sm:$0xf] }
 0x124   :  { %v857_v10 = vpop.eup %856  ;;  %v270_v12 = vadd.f32 %v726_v9, %v93_v8  ;;  %v264_v13 = vpop.f32.mrb[7].mxu0  ;;  %v559_v8 = vld [vmem:[%s1152_s1] sm:$0xf] }
 0x125   :  { %v859_v14 = vpop.eup %858  ;;  %v265_v15 = vadd.f32 %v264_v13, %v88_v11  ;;  %vm560_vm4 = vcmp.ne.f32.partialorder %v559_v8, %v559_v8  ;;  %v480_v9 = vpop.permute.xlu0 %479 }
 0x126   :  { %868 = vtanh.f32 %v270_v12  ;;  %v822_v16 = vpack.c.bf16 %v857_v10, %v859_v14  ;;  %v561_v11 = vsel %vm560_vm4, 0.0, %v559_v8 }
 0x127   :  { %870 = vtanh.f32 %v265_v15  ;;  %v633_v14 = vclamps-f32 %v561_v11, 3.4028235e+38 }
 0x128   :  { %v861_v17 = vpop.eup %860  ;;  %823 = vmatprep.subr.bf16.mxu1 %v822_v16 }
 0x129   :  { %v863_v18 = vpop.eup %862  ;;  %825 = vmatpush3.bf16.msra.mxu1 %v822_v16 }
 0x12a   :  { %v826_v19 = vpack.c.bf16 %v861_v17, %v863_v18  ;;  %v569_v18 = vpop.permute.xlu1 %568 }
 0x12c   :  { %v865_v20 = vpop.eup %864  ;;  %827 = vmatprep.subr.bf16.mxu1 %v826_v19 }
 0x12d   :  { %v867_v21 = vpop.eup %866  ;;  %829 = vmatpush3.bf16.msra.mxu1 %v826_v19 }
 0x12e   :  { %v830_v22 = vpack.c.bf16 %v865_v20, %v867_v21 }
 0x130   :  { %v869_v23 = vpop.eup %868  ;;  %831 = vmatprep.subr.bf16.mxu1 %v830_v22 }
 0x131   :  { %v871_v24 = vpop.eup %870  ;;  %833 = vmatpush3.bf16.msra.mxu1 %v830_v22 }
 0x132   :  { %v834_v25 = vpack.c.bf16 %v869_v23, %v871_v24 }
 0x134   :  { %835 = vmatprep.subr.bf16.mxu1 %v834_v25 }
 0x135   :  { %837 = vmatpush3.bf16.msra.mxu1 %v834_v25  ;;  %v590_v25 = vlaneseq }
 0x136   :  { %838 = vmatprep.subr.bf16.mxu1 %v889_v33 }
 0x138   :  { %744 = vmatmul.mubr.msk.f32.vlgmr.msra.gmra.mrb[0].mxu1 %vm337_vm2, %v282_v26 }
 0x139   :  { %746 = vmatprep.mubr.msk.f32.mxu1 %vm337_vm2, %v283_v27 }
 0x13c   :  { %747 = vmatmul.mubr.msk.f32.gmra.mrb[2].mxu1 %vm337_vm2, %v284_v28  ;;  %v591_v28 = vshrl.u32 %v590_v25, 7 }
 0x13d   :  { %749 = vmatprep.mubr.msk.f32.mxu1 %vm337_vm2, %v285_v29 }
 0x140   :  { %750 = vmatmul.mubr.msk.f32.gmra.mrb[4].mxu1 %vm337_vm2, %v286_v30 }
 0x141   :  { %752 = vmatprep.mubr.msk.f32.mxu1 %vm337_vm2, %v287_v31  ;;  %v592_v31 = vsub.s32 0, %v591_v28 }
 0x144   :  { %753 = vmatmul.mubr.msk.f32.gmra.mrb[6].mxu1 %vm337_vm2, %v288_v32  ;;  %v586_v32 = vpop.permute.xlu0 %585 }
 0x145   :  { %771 = vmatprep.mubr.msk.f32.mxu1 %vm890_vm3, %v891_v34 }
 0x20b   :  { %v745_v38 = vpop.f32.mrb[0].mxu1 }
 0x20c   :  { %v434_v40 = vadd.f32 %v745_v38, %v305_v35  ;;  %v428_v41 = vpop.f32.mrb[1].mxu1 }
 0x20d   :  { %v429_v42 = vadd.f32 %v428_v41, %v300_v36 }
 0x20e   :  { %872 = vtanh.f32 %v434_v40 }
 0x20f   :  { %874 = vtanh.f32 %v429_v42  ;;  %v748_v43 = vpop.f32.mrb[2].mxu1 }
 0x210   :  { %v444_v44 = vadd.f32 %v748_v43, %v315_v37  ;;  %v438_v45 = vpop.f32.mrb[3].mxu1 }
 0x211   :  { %v439_v47 = vadd.f32 %v438_v45, %v310_v39 }
 0x212   :  { %876 = vtanh.f32 %v444_v44 }
 0x213   :  { %878 = vtanh.f32 %v439_v47  ;;  %v751_v49 = vpop.f32.mrb[4].mxu1 }
 0x214   :  { %v454_v50 = vadd.f32 %v751_v49, %v325_v46  ;;  %v448_v51 = vpop.f32.mrb[5].mxu1 }
 0x215   :  { %v449_v52 = vadd.f32 %v448_v51, %v320_v48 }
 0x216   :  { %880 = vtanh.f32 %v454_v50 }
 0x217   :  { %882 = vtanh.f32 %v449_v52  ;;  %v754_v54 = vpop.f32.mrb[6].mxu1 }
 0x218   :  { %v873_v55 = vpop.eup %872  ;;  %v464_v57 = vadd.f32 %v754_v54, %v335_v53  ;;  %v458_v58 = vpop.f32.mrb[7].mxu1 }
 0x219   :  { %v875_v59 = vpop.eup %874  ;;  %v459_v60 = vadd.f32 %v458_v58, %v330_v56 }
 0x21a   :  { %884 = vtanh.f32 %v464_v57  ;;  %v839_v61 = vpack.c.bf16 %v873_v55, %v875_v59 }
 0x21b   :  { %886 = vtanh.f32 %v459_v60 }
 0x21c   :  { %v877_v62 = vpop.eup %876  ;;  %840 = vmatpush3.bf16.msra.mxu1 %v839_v61 }
 0x21d   :  { %v879_v63 = vpop.eup %878  ;;  %841 = vmatprep.subr.bf16.mxu1 %v889_v33 }
 0x21e   :  { %v842_v0 = vpack.c.bf16 %v877_v62, %v879_v63 }
 0x220   :  { %v881_v1 = vpop.eup %880  ;;  %843 = vmatpush3.bf16.msra.mxu1 %v842_v0 }
 0x221   :  { %v883_v2 = vpop.eup %882  ;;  %844 = vmatprep.subr.bf16.mxu1 %v889_v33 }
 0x222   :  { %v845_v3 = vpack.c.bf16 %v881_v1, %v883_v2 }
 0x224   :  { %v885_v4 = vpop.eup %884  ;;  %846 = vmatpush3.bf16.msra.mxu1 %v845_v3 }
 0x225   :  { %v887_v5 = vpop.eup %886  ;;  %847 = vmatprep.subr.bf16.mxu1 %v889_v33 }
 0x226   :  { %v848_v6 = vpack.c.bf16 %v885_v4, %v887_v5 }
 0x228   :  { %849 = vmatpush3.bf16.msra.mxu1 %v848_v6 }
 0x22b   :  { %772 = vmatmul.mubr.msk.f32.vlgmr.msra.gmra.mrb[8].mxu1 %vm337_vm2, %v475_v7 }
 0x2fe   :  { %v551_v10 = vpop.f32.mrb[8].mxu1 }
 0x2ff   :  { %v552_v12 = vadd.f32 %v551_v10, %v480_v9  ;;  %v773_v13 = vpop.f32.mrb[9].mxu1 }
 0x301   :  { %vm555_vm5 = vcmp.ne.f32.partialorder %v552_v12, %v552_v12 }
 0x302   :  { %v556_v15 = vsel %vm555_vm5, 0.0, %v552_v12 }
 0x303   :  { %v632_v16 = vclamps-f32 %v556_v15, 3.4028235e+38 }
 0x305   :  { %v564_v17 = vsub.f32 %v633_v14, %v632_v16  ;;  %589 = vst [vmem:[%s1153_s6] sm:$0xf] %v632_v16 }
 0x307   :  { %v571_v19 = vmul.f32 %v569_v18, %v564_v17 }
 0x309   :  { %v572_v20 = vmul.f32 %v571_v19, %v571_v19 }
 0x30b   :  { %v573_v21 = vmul.f32 -0.5, %v572_v20 }
 0x30d   :  { %v575_v22 = vsel %vm574_vm6, %v573_v21, 0.0 }
 0x30e   :  { %v576_v23 = vrot.slane %v575_v22, 4 }
 0x310   :  { %v577_v24 = vadd.f32 %v576_v23, %v575_v22 }
 0x312   :  { %v578_v26 = vrot.slane %v577_v24, 2 }
 0x314   :  { %v579_v27 = vadd.f32 %v578_v26, %v577_v24 }
 0x316   :  { %v580_v29 = vrot.slane %v579_v27, 1 }
 0x318   :  { %v581_v30 = vadd.f32 %v580_v29, %v579_v27 }
 0x31a   :  { %v588_v33 = vadd.f32 %v586_v32, %v581_v30 }
 0x31c   :  { %v593_v34 = vrot.slane %v588_v33, %v592_v31 }
 0x31e   :  { %594 = vst [vmem:[%s1153_s6 + $0x4] sm:$0xf] %v593_v34 }

</bundles_post_ra>
